<compile_context>
chip_gen: v7x
topology: tpu7x:2x2x1
jax: 0.10.0
libtpu: 0.0.40
codegen_flags: <defaults>
</compile_context>

<pallas_src>
import functools

import jax
import jax.numpy as jnp
from jax import lax
from jax.experimental import pallas as pl
from jax.experimental.pallas import tpu as pltpu


def _mha_kernel(x_ref, wqkv_ref, bqkv_ref, wp_ref, bp_ref, o_ref,
                qkv_ref, merged_ref, *, num_heads, heads_per_group, scale,
                compute_dtype):
    # x_ref block: (block_b, N, E), already in compute_dtype.
    block_b, N, E = x_ref.shape
    H = num_heads
    G = heads_per_group
    D = E // H
    rows = block_b * N
    cdt = compute_dtype

    # Flatten batch into the matmul M dimension (merging leading dims is cheap).
    x2d = x_ref[...].reshape(rows, E)

    # Fused QKV projection: one (rows, E) @ (E, 3E) MXU matmul, f32 accumulation,
    # bias added in f32, then stored once to VMEM scratch in compute_dtype so the
    # big f32 value is dead before the head loop starts.
    qkv_f32 = jnp.dot(x2d, wqkv_ref[...],
                      preferred_element_type=jnp.float32) + bqkv_ref[...]
    qkv_ref[...] = qkv_f32.astype(cdt)

    # Heads are processed in groups of G so each merged_ref store is G*D lanes
    # wide (a multiple of 128 -> unmasked, lane-dense vst).
    for g in range(H // G):
        outs = []
        for hh in range(G):
            h = g * G + hh
            # Static lane slices of the QKV scratch (q | k | v blocks).
            qh = qkv_ref[:, h * D:(h + 1) * D].reshape(block_b, N, D)
            kh = qkv_ref[:, E + h * D:E + (h + 1) * D].reshape(block_b, N, D)
            vh = qkv_ref[:, 2 * E + h * D:2 * E + (h + 1) * D].reshape(block_b, N, D)

            # scores: (block_b, N, N) == einsum('bqd,bkd->bqk'), f32 accumulation.
            scores = lax.dot_general(
                qh, kh, (((2,), (2,)), ((0,), (0,))),
                preferred_element_type=jnp.float32)

            # Softmax over last axis in f32, THEN multiply by scale (matches the
            # PyTorch code).  The scale is folded into the (block_b, N, 1)
            # approximate reciprocal (EUP slot) -> no extra (N,N) VALU multiply.
            row_max = jnp.max(scores, axis=-1, keepdims=True)
            p = jnp.exp(scores - row_max)
            denom = jnp.sum(p, axis=-1, keepdims=True)
            attn = p * (scale * pl.reciprocal(denom, approx=True))

            # out_h: (block_b, N, D) == einsum('bqk,bkd->bqd')
            out_h = lax.dot_general(
                attn.astype(cdt), vh, (((2,), (1,)), ((0,), (0,))),
                preferred_element_type=jnp.float32)
            outs.append(out_h.astype(cdt))

        # One lane-dense (rows, G*D) store per head group; head intermediates
        # die at the end of each group iteration (bounded live ranges).
        slab = outs[0] if G == 1 else jnp.concatenate(outs, axis=-1)
        merged_ref[:, g * G * D:(g + 1) * G * D] = slab.reshape(rows, G * D)

    # Output projection on the merged (rows, E) buffer: single deep matmul.
    out = jnp.dot(merged_ref[...], wp_ref[...],
                  preferred_element_type=jnp.float32) + bp_ref[...]
    o_ref[...] = out.reshape(block_b, N, E).astype(o_ref.dtype)


def _heads_per_group(num_heads, head_dim):
    """Smallest divisor g of num_heads with (g * head_dim) % 128 == 0 (else H)."""
    for g in range(1, num_heads + 1):
        if num_heads % g == 0 and (g * head_dim) % 128 == 0:
            return g
    return num_heads


def _vmem_estimate_bytes(block_b, N, E, H, cdt_bytes, x_bytes, out_bytes):
    rows = block_b * N
    D = E // H
    weights = 3 * E * E * cdt_bytes + E * E * cdt_bytes + 4 * E * 4
    io = 2 * rows * E * x_bytes + 2 * rows * E * out_bytes      # double-buffered blocks
    scratch = rows * 3 * E * cdt_bytes + rows * E * cdt_bytes   # qkv + merged scratch
    # Live f32 intermediates: fused QKV before the scratch store, ~3x a per-head
    # (N, N) scores tile (scores / exp / attn), a few (rows, D) head outputs.
    live = rows * 3 * E * 4 + 3 * block_b * N * N * 4 + 4 * rows * D * 4
    return weights + io + scratch + live


def _choose_block_b(B, N, E, H, cdt_bytes, x_bytes, out_bytes,
                    budget_bytes, target_rows=1024):
    divisors = [d for d in range(1, B + 1) if B % d == 0]
    # Keep >= 2 grid steps whenever possible so v7x's 2 TensorCores both get
    # work from the "parallel" grid axis (cheap on 1-TC v5e/v6e: ~0.35us/step).
    candidates = [d for d in divisors if B // d >= 2] or divisors
    for d in sorted(candidates, reverse=True):
        est = _vmem_estimate_bytes(d, N, E, H, cdt_bytes, x_bytes, out_bytes)
        if d * N <= target_rows and est <= budget_bytes:
            return d
    return 1


def multi_head_attention(x, params, *, num_heads,
                         compute_dtype=jnp.bfloat16, block_b=None):
    """x: (B, N, E). params: weights stored as (in, out), biases as (1, out)."""
    B, N, E = x.shape
    assert E % num_heads == 0
    D = E // num_heads
    scale = float(D ** (-0.5))
    cdt_bytes = jnp.dtype(compute_dtype).itemsize
    out_bytes = jnp.dtype(x.dtype).itemsize

    # Fuse Q/K/V into one (E, 3E) weight + (1, 3E) bias and pre-cast weights and
    # activations to the MXU compute dtype once, outside the kernel (halves
    # weight VMEM residency and HBM->VMEM DMA; no per-step casts in the kernel).
    wqkv = jnp.concatenate([params["wq"], params["wk"], params["wv"]],
                           axis=1).astype(compute_dtype)
    bqkv = jnp.concatenate([params["bq"], params["bk"], params["bv"]],
                           axis=1).astype(jnp.float32)
    wp = params["wp"].astype(compute_dtype)
    bp = params["bp"].astype(jnp.float32)
    x_c = x.astype(compute_dtype)

    budget_bytes = 40 * 1024 * 1024  # conservative: fits v7x's 64 MiB VMEM/TC
    if block_b is None:
        block_b = _choose_block_b(B, N, E, num_heads, cdt_bytes, cdt_bytes,
                                  out_bytes, budget_bytes)
    assert B % block_b == 0
    rows = block_b * N

    est = _vmem_estimate_bytes(block_b, N, E, num_heads, cdt_bytes, cdt_bytes,
                               out_bytes)
    vmem_limit = int(min(max(est + est // 2 + (4 << 20), 16 << 20), 60 << 20))

    heads_per_group = _heads_per_group(num_heads, D)

    kernel = functools.partial(_mha_kernel, num_heads=num_heads,
                               heads_per_group=heads_per_group, scale=scale,
                               compute_dtype=compute_dtype)

    # Grid-invariant weights/biases: whole array resident in VMEM once
    # (no per-step DMA, no double-buffered copies).
    vmem_full = pl.BlockSpec(memory_space=pltpu.MemorySpace.VMEM)

    return pl.pallas_call(
        kernel,
        out_shape=jax.ShapeDtypeStruct((B, N, E), x.dtype),
        grid_spec=pltpu.PrefetchScalarGridSpec(
            num_scalar_prefetch=0,
            grid=(B // block_b,),
            in_specs=[
                pl.BlockSpec((block_b, N, E), lambda b: (b, 0, 0)),  # x (cdt)
                vmem_full, vmem_full,                                # Wqkv, bqkv
                vmem_full, vmem_full,                                # Wp,   bp
            ],
            out_specs=pl.BlockSpec((block_b, N, E), lambda b: (b, 0, 0)),
            scratch_shapes=[
                pltpu.VMEM((rows, 3 * E), compute_dtype),   # fused QKV scratch
                pltpu.VMEM((rows, E), compute_dtype),       # merged heads scratch
            ],
        ),
        compiler_params=pltpu.CompilerParams(
            dimension_semantics=("parallel",),
            vmem_limit_bytes=vmem_limit),
    )(x_c, wqkv, bqkv, wp, bp)


def _reference(x, params, *, num_heads):
    """Pure-JAX reference of the PyTorch forward (mask=None, dropout=0)."""
    B, N, E = x.shape
    D = E // num_heads
    scale = (E // num_heads) ** (-0.5)

    def lin(x, w, b):
        return x @ w + b[0]

    q = lin(x, params["wq"], params["bq"]).reshape(B, N, num_heads, D).transpose(0, 2, 1, 3)
    k = lin(x, params["wk"], params["bk"]).reshape(B, N, num_heads, D).transpose(0, 2, 1, 3)
    v = lin(x, params["wv"], params["bv"]).reshape(B, N, num_heads, D).transpose(0, 2, 1, 3)
    scores = jnp.einsum("bhqd,bhkd->bhqk", q, k)
    attn = jax.nn.softmax(scores, axis=-1) * scale
    out = jnp.einsum("bhqk,bhkd->bhqd", attn, v)
    out = out.transpose(0, 2, 1, 3).reshape(B, N, E)
    return lin(out, params["wp"], params["bp"])


if __name__ == "__main__":
    # Small shapes consistent with the module; E is a multiple of 128 so output
    # stores are lane-dense.  batch=2, seq=16, emb=128, heads=4.
    B, N, E, H = 2, 16, 128, 4

    key = jax.random.PRNGKey(0)
    keys = jax.random.split(key, 9)
    std = 1.0 / (E ** 0.5)
    params = {
        "wq": jax.random.normal(keys[0], (E, E), jnp.float32) * std,
        "bq": jax.random.normal(keys[1], (1, E), jnp.float32) * 0.01,
        "wk": jax.random.normal(keys[2], (E, E), jnp.float32) * std,
        "bk": jax.random.normal(keys[3], (1, E), jnp.float32) * 0.01,
        "wv": jax.random.normal(keys[4], (E, E), jnp.float32) * std,
        "bv": jax.random.normal(keys[5], (1, E), jnp.float32) * 0.01,
        "wp": jax.random.normal(keys[6], (E, E), jnp.float32) * std,
        "bp": jax.random.normal(keys[7], (1, E), jnp.float32) * 0.01,
    }
    x = jax.random.normal(keys[8], (B, N, E), jnp.float32)

    ref = _reference(x, params, num_heads=H)

    # Default fast path: bf16 MXU operands, f32 accumulation + f32 softmax
    # (MXU-native on v5e/v6e/v7x).
    out_bf16 = jax.block_until_ready(
        multi_head_attention(x, params, num_heads=H, compute_dtype=jnp.bfloat16))
    assert out_bf16.shape == (B, N, E)
    assert jnp.allclose(out_bf16, ref, atol=2e-2, rtol=2e-2), \
        f"bf16 max err {jnp.max(jnp.abs(out_bf16 - ref))}"

    # Full-precision path (numerical sanity check against the reference).
    out_f32 = jax.block_until_ready(
        multi_head_attention(x, params, num_heads=H, compute_dtype=jnp.float32))
    assert out_f32.shape == (B, N, E)
    assert jnp.allclose(out_f32, ref, atol=5e-3, rtol=5e-3), \
        f"f32 max err {jnp.max(jnp.abs(out_f32 - ref))}"

    print("KERNEL_OK")
</pallas_src>

<mosaic_0001>
module attributes {stable_mosaic.version = 11 : i64} {
  func.func @_mha_kernel(%arg0: i32, %arg1: memref<1x16x128xbf16, #tpu.memory_space<vmem>>, %arg2: memref<128x384xbf16, #tpu.memory_space<vmem>>, %arg3: memref<1x384xf32, #tpu.memory_space<vmem>>, %arg4: memref<128x128xbf16, #tpu.memory_space<vmem>>, %arg5: memref<1x128xf32, #tpu.memory_space<vmem>>, %arg6: memref<1x16x128xf32, #tpu.memory_space<vmem>>, %arg7: memref<16x384xbf16, #tpu.memory_space<vmem>>, %arg8: memref<16x128xbf16, #tpu.memory_space<vmem>>) attributes {dimension_semantics = [#tpu.dimension_semantics<parallel>], iteration_bounds = array<i64: 2>, scalar_prefetch = 0 : i64, scratch_operands = 2 : i64, tpu.core_type = #tpu.core_type<tc>, window_params = [{transform_indices = @transform_0, window_bounds = array<i64: 1, 16, 128>}, {pipeline_mode = #tpu.pipeline_mode<synchronous>, transform_indices = @transform_1, window_bounds = array<i64: 128, 384>}, {pipeline_mode = #tpu.pipeline_mode<synchronous>, transform_indices = @transform_2, window_bounds = array<i64: 1, 384>}, {pipeline_mode = #tpu.pipeline_mode<synchronous>, transform_indices = @transform_3, window_bounds = array<i64: 128, 128>}, {pipeline_mode = #tpu.pipeline_mode<synchronous>, transform_indices = @transform_4, window_bounds = array<i64: 1, 128>}, {transform_indices = @transform_5, window_bounds = array<i64: 1, 16, 128>}]} {
    %c0 = arith.constant 0 : index
    %c0_0 = arith.constant 0 : index
    %c0_1 = arith.constant 0 : index
    %0 = vector.load %arg1[%c0, %c0_0, %c0_1] : memref<1x16x128xbf16, #tpu.memory_space<vmem>>, vector<1x16x128xbf16>
    %1 = vector.shape_cast %0 : vector<1x16x128xbf16> to vector<16x128xbf16>
    %c0_2 = arith.constant 0 : index
    %c0_3 = arith.constant 0 : index
    %2 = vector.load %arg2[%c0_2, %c0_3] : memref<128x384xbf16, #tpu.memory_space<vmem>>, vector<128x384xbf16>
    %cst = arith.constant dense<0.000000e+00> : vector<16x384xf32>
    %3 = tpu.matmul %1, %2, %cst {dimension_numbers = #tpu.dot_dimension_numbers<[1], [0], [0], [1], [0, 0, 1, 1], [], []>} : vector<16x128xbf16>, vector<128x384xbf16>, vector<16x384xf32> -> vector<16x384xf32>
    %c0_4 = arith.constant 0 : index
    %c0_5 = arith.constant 0 : index
    %4 = vector.load %arg3[%c0_4, %c0_5] : memref<1x384xf32, #tpu.memory_space<vmem>>, vector<1x384xf32>
    %5 = vector.broadcast %4 : vector<1x384xf32> to vector<16x384xf32>
    %6 = arith.addf %3, %5 : vector<16x384xf32>
    %7 = arith.truncf %6 : vector<16x384xf32> to vector<16x384xbf16>
    %c0_6 = arith.constant 0 : index
    %c0_7 = arith.constant 0 : index
    %8 = vector.load %arg7[%c0_6, %c0_7] : memref<16x384xbf16, #tpu.memory_space<vmem>>, vector<16x384xbf16>
    tpu.vector_store %arg7[%c0_6, %c0_7], %7 {strides = array<i32>} : memref<16x384xbf16, #tpu.memory_space<vmem>>, vector<16x384xbf16>,
    %c0_8 = arith.constant 0 : index
    %c0_9 = arith.constant 0 : index
    %9 = vector.load %arg7[%c0_8, %c0_9] : memref<16x384xbf16, #tpu.memory_space<vmem>>, vector<16x32xbf16>
    %10 = vector.shape_cast %9 : vector<16x32xbf16> to vector<1x16x32xbf16>
    %c0_10 = arith.constant 0 : index
    %c128 = arith.constant 128 : index
    %11 = vector.load %arg7[%c0_10, %c128] : memref<16x384xbf16, #tpu.memory_space<vmem>>, vector<16x32xbf16>
    %12 = vector.shape_cast %11 : vector<16x32xbf16> to vector<1x16x32xbf16>
    %c0_11 = arith.constant 0 : index
    %c256 = arith.constant 256 : index
    %13 = vector.load %arg7[%c0_11, %c256] : memref<16x384xbf16, #tpu.memory_space<vmem>>, vector<16x32xbf16>
    %14 = vector.shape_cast %13 : vector<16x32xbf16> to vector<1x16x32xbf16>
    %cst_12 = arith.constant dense<0.000000e+00> : vector<1x16x16xf32>
    %15 = tpu.matmul %10, %12, %cst_12 {dimension_numbers = #tpu.dot_dimension_numbers<[2], [2], [1], [1], [0, 0, 0, 1, 1, 1], [0], [0]>} : vector<1x16x32xbf16>, vector<1x16x32xbf16>, vector<1x16x16xf32> -> vector<1x16x16xf32>
    %cst_13 = arith.constant dense<0xFF800000> : vector<1x16xf32>
    %16 = vector.multi_reduction <maximumf>, %15, %cst_13 [2] : vector<1x16x16xf32> to vector<1x16xf32>
    %17 = vector.shape_cast %16 : vector<1x16xf32> to vector<1x16x1xf32>
    %18 = vector.broadcast %17 : vector<1x16x1xf32> to vector<1x16x16xf32>
    %19 = arith.subf %15, %18 : vector<1x16x16xf32>
    %20 = math.exp %19 : vector<1x16x16xf32>
    %cst_14 = arith.constant dense<0.000000e+00> : vector<1x16xf32>
    %21 = vector.multi_reduction <add>, %20, %cst_14 [2] : vector<1x16x16xf32> to vector<1x16xf32>
    %22 = vector.shape_cast %21 : vector<1x16xf32> to vector<1x16x1xf32>
    %23 = tpu.reciprocal %22 {approx = true} : vector<1x16x1xf32> -> vector<1x16x1xf32>
    %cst_15 = arith.constant 0.176776692 : f32
    %24 = vector.broadcast %cst_15 : f32 to vector<1x16x1xf32>
    %25 = arith.mulf %24, %23 : vector<1x16x1xf32>
    %26 = vector.broadcast %25 : vector<1x16x1xf32> to vector<1x16x16xf32>
    %27 = arith.mulf %20, %26 : vector<1x16x16xf32>
    %28 = arith.truncf %27 : vector<1x16x16xf32> to vector<1x16x16xbf16>
    %cst_16 = arith.constant dense<0.000000e+00> : vector<1x16x32xf32>
    %29 = tpu.matmul %28, %14, %cst_16 {dimension_numbers = #tpu.dot_dimension_numbers<[2], [1], [1], [2], [0, 0, 0, 1, 1, 2], [0], [0]>} : vector<1x16x16xbf16>, vector<1x16x32xbf16>, vector<1x16x32xf32> -> vector<1x16x32xf32>
    %30 = arith.truncf %29 : vector<1x16x32xf32> to vector<1x16x32xbf16>
    %c0_17 = arith.constant 0 : index
    %c32 = arith.constant 32 : index
    %31 = vector.load %arg7[%c0_17, %c32] : memref<16x384xbf16, #tpu.memory_space<vmem>>, vector<16x32xbf16>
    %32 = vector.shape_cast %31 : vector<16x32xbf16> to vector<1x16x32xbf16>
    %c0_18 = arith.constant 0 : index
    %c160 = arith.constant 160 : index
    %33 = vector.load %arg7[%c0_18, %c160] : memref<16x384xbf16, #tpu.memory_space<vmem>>, vector<16x32xbf16>
    %34 = vector.shape_cast %33 : vector<16x32xbf16> to vector<1x16x32xbf16>
    %c0_19 = arith.constant 0 : index
    %c288 = arith.constant 288 : index
    %35 = vector.load %arg7[%c0_19, %c288] : memref<16x384xbf16, #tpu.memory_space<vmem>>, vector<16x32xbf16>
    %36 = vector.shape_cast %35 : vector<16x32xbf16> to vector<1x16x32xbf16>
    %cst_20 = arith.constant dense<0.000000e+00> : vector<1x16x16xf32>
    %37 = tpu.matmul %32, %34, %cst_20 {dimension_numbers = #tpu.dot_dimension_numbers<[2], [2], [1], [1], [0, 0, 0, 1, 1, 1], [0], [0]>} : vector<1x16x32xbf16>, vector<1x16x32xbf16>, vector<1x16x16xf32> -> vector<1x16x16xf32>
    %cst_21 = arith.constant dense<0xFF800000> : vector<1x16xf32>
    %38 = vector.multi_reduction <maximumf>, %37, %cst_21 [2] : vector<1x16x16xf32> to vector<1x16xf32>
    %39 = vector.shape_cast %38 : vector<1x16xf32> to vector<1x16x1xf32>
    %40 = vector.broadcast %39 : vector<1x16x1xf32> to vector<1x16x16xf32>
    %41 = arith.subf %37, %40 : vector<1x16x16xf32>
    %42 = math.exp %41 : vector<1x16x16xf32>
    %cst_22 = arith.constant dense<0.000000e+00> : vector<1x16xf32>
    %43 = vector.multi_reduction <add>, %42, %cst_22 [2] : vector<1x16x16xf32> to vector<1x16xf32>
    %44 = vector.shape_cast %43 : vector<1x16xf32> to vector<1x16x1xf32>
    %45 = tpu.reciprocal %44 {approx = true} : vector<1x16x1xf32> -> vector<1x16x1xf32>
    %cst_23 = arith.constant 0.176776692 : f32
    %46 = vector.broadcast %cst_23 : f32 to vector<1x16x1xf32>
    %47 = arith.mulf %46, %45 : vector<1x16x1xf32>
    %48 = vector.broadcast %47 : vector<1x16x1xf32> to vector<1x16x16xf32>
    %49 = arith.mulf %42, %48 : vector<1x16x16xf32>
    %50 = arith.truncf %49 : vector<1x16x16xf32> to vector<1x16x16xbf16>
    %cst_24 = arith.constant dense<0.000000e+00> : vector<1x16x32xf32>
    %51 = tpu.matmul %50, %36, %cst_24 {dimension_numbers = #tpu.dot_dimension_numbers<[2], [1], [1], [2], [0, 0, 0, 1, 1, 2], [0], [0]>} : vector<1x16x16xbf16>, vector<1x16x32xbf16>, vector<1x16x32xf32> -> vector<1x16x32xf32>
    %52 = arith.truncf %51 : vector<1x16x32xf32> to vector<1x16x32xbf16>
    %c0_25 = arith.constant 0 : index
    %c64 = arith.constant 64 : index
    %53 = vector.load %arg7[%c0_25, %c64] : memref<16x384xbf16, #tpu.memory_space<vmem>>, vector<16x32xbf16>
    %54 = vector.shape_cast %53 : vector<16x32xbf16> to vector<1x16x32xbf16>
    %c0_26 = arith.constant 0 : index
    %c192 = arith.constant 192 : index
    %55 = vector.load %arg7[%c0_26, %c192] : memref<16x384xbf16, #tpu.memory_space<vmem>>, vector<16x32xbf16>
    %56 = vector.shape_cast %55 : vector<16x32xbf16> to vector<1x16x32xbf16>
    %c0_27 = arith.constant 0 : index
    %c320 = arith.constant 320 : index
    %57 = vector.load %arg7[%c0_27, %c320] : memref<16x384xbf16, #tpu.memory_space<vmem>>, vector<16x32xbf16>
    %58 = vector.shape_cast %57 : vector<16x32xbf16> to vector<1x16x32xbf16>
    %cst_28 = arith.constant dense<0.000000e+00> : vector<1x16x16xf32>
    %59 = tpu.matmul %54, %56, %cst_28 {dimension_numbers = #tpu.dot_dimension_numbers<[2], [2], [1], [1], [0, 0, 0, 1, 1, 1], [0], [0]>} : vector<1x16x32xbf16>, vector<1x16x32xbf16>, vector<1x16x16xf32> -> vector<1x16x16xf32>
    %cst_29 = arith.constant dense<0xFF800000> : vector<1x16xf32>
    %60 = vector.multi_reduction <maximumf>, %59, %cst_29 [2] : vector<1x16x16xf32> to vector<1x16xf32>
    %61 = vector.shape_cast %60 : vector<1x16xf32> to vector<1x16x1xf32>
    %62 = vector.broadcast %61 : vector<1x16x1xf32> to vector<1x16x16xf32>
    %63 = arith.subf %59, %62 : vector<1x16x16xf32>
    %64 = math.exp %63 : vector<1x16x16xf32>
    %cst_30 = arith.constant dense<0.000000e+00> : vector<1x16xf32>
    %65 = vector.multi_reduction <add>, %64, %cst_30 [2] : vector<1x16x16xf32> to vector<1x16xf32>
    %66 = vector.shape_cast %65 : vector<1x16xf32> to vector<1x16x1xf32>
    %67 = tpu.reciprocal %66 {approx = true} : vector<1x16x1xf32> -> vector<1x16x1xf32>
    %cst_31 = arith.constant 0.176776692 : f32
    %68 = vector.broadcast %cst_31 : f32 to vector<1x16x1xf32>
    %69 = arith.mulf %68, %67 : vector<1x16x1xf32>
    %70 = vector.broadcast %69 : vector<1x16x1xf32> to vector<1x16x16xf32>
    %71 = arith.mulf %64, %70 : vector<1x16x16xf32>
    %72 = arith.truncf %71 : vector<1x16x16xf32> to vector<1x16x16xbf16>
    %cst_32 = arith.constant dense<0.000000e+00> : vector<1x16x32xf32>
    %73 = tpu.matmul %72, %58, %cst_32 {dimension_numbers = #tpu.dot_dimension_numbers<[2], [1], [1], [2], [0, 0, 0, 1, 1, 2], [0], [0]>} : vector<1x16x16xbf16>, vector<1x16x32xbf16>, vector<1x16x32xf32> -> vector<1x16x32xf32>
    %74 = arith.truncf %73 : vector<1x16x32xf32> to vector<1x16x32xbf16>
    %c0_33 = arith.constant 0 : index
    %c96 = arith.constant 96 : index
    %75 = vector.load %arg7[%c0_33, %c96] : memref<16x384xbf16, #tpu.memory_space<vmem>>, vector<16x32xbf16>
    %76 = vector.shape_cast %75 : vector<16x32xbf16> to vector<1x16x32xbf16>
    %c0_34 = arith.constant 0 : index
    %c224 = arith.constant 224 : index
    %77 = vector.load %arg7[%c0_34, %c224] : memref<16x384xbf16, #tpu.memory_space<vmem>>, vector<16x32xbf16>
    %78 = vector.shape_cast %77 : vector<16x32xbf16> to vector<1x16x32xbf16>
    %c0_35 = arith.constant 0 : index
    %c352 = arith.constant 352 : index
    %79 = vector.load %arg7[%c0_35, %c352] : memref<16x384xbf16, #tpu.memory_space<vmem>>, vector<16x32xbf16>
    %80 = vector.shape_cast %79 : vector<16x32xbf16> to vector<1x16x32xbf16>
    %cst_36 = arith.constant dense<0.000000e+00> : vector<1x16x16xf32>
    %81 = tpu.matmul %76, %78, %cst_36 {dimension_numbers = #tpu.dot_dimension_numbers<[2], [2], [1], [1], [0, 0, 0, 1, 1, 1], [0], [0]>} : vector<1x16x32xbf16>, vector<1x16x32xbf16>, vector<1x16x16xf32> -> vector<1x16x16xf32>
    %cst_37 = arith.constant dense<0xFF800000> : vector<1x16xf32>
    %82 = vector.multi_reduction <maximumf>, %81, %cst_37 [2] : vector<1x16x16xf32> to vector<1x16xf32>
    %83 = vector.shape_cast %82 : vector<1x16xf32> to vector<1x16x1xf32>
    %84 = vector.broadcast %83 : vector<1x16x1xf32> to vector<1x16x16xf32>
    %85 = arith.subf %81, %84 : vector<1x16x16xf32>
    %86 = math.exp %85 : vector<1x16x16xf32>
    %cst_38 = arith.constant dense<0.000000e+00> : vector<1x16xf32>
    %87 = vector.multi_reduction <add>, %86, %cst_38 [2] : vector<1x16x16xf32> to vector<1x16xf32>
    %88 = vector.shape_cast %87 : vector<1x16xf32> to vector<1x16x1xf32>
    %89 = tpu.reciprocal %88 {approx = true} : vector<1x16x1xf32> -> vector<1x16x1xf32>
    %cst_39 = arith.constant 0.176776692 : f32
    %90 = vector.broadcast %cst_39 : f32 to vector<1x16x1xf32>
    %91 = arith.mulf %90, %89 : vector<1x16x1xf32>
    %92 = vector.broadcast %91 : vector<1x16x1xf32> to vector<1x16x16xf32>
    %93 = arith.mulf %86, %92 : vector<1x16x16xf32>
    %94 = arith.truncf %93 : vector<1x16x16xf32> to vector<1x16x16xbf16>
    %cst_40 = arith.constant dense<0.000000e+00> : vector<1x16x32xf32>
    %95 = tpu.matmul %94, %80, %cst_40 {dimension_numbers = #tpu.dot_dimension_numbers<[2], [1], [1], [2], [0, 0, 0, 1, 1, 2], [0], [0]>} : vector<1x16x16xbf16>, vector<1x16x32xbf16>, vector<1x16x32xf32> -> vector<1x16x32xf32>
    %96 = arith.truncf %95 : vector<1x16x32xf32> to vector<1x16x32xbf16>
    %97 = tpu.concatenate %30, %52, %74, %96 in 2 : vector<1x16x32xbf16>, vector<1x16x32xbf16>, vector<1x16x32xbf16>, vector<1x16x32xbf16> -> vector<1x16x128xbf16>
    %98 = vector.shape_cast %97 : vector<1x16x128xbf16> to vector<16x128xbf16>
    %c0_41 = arith.constant 0 : index
    %c0_42 = arith.constant 0 : index
    %99 = vector.load %arg8[%c0_41, %c0_42] : memref<16x128xbf16, #tpu.memory_space<vmem>>, vector<16x128xbf16>
    tpu.vector_store %arg8[%c0_41, %c0_42], %98 {strides = array<i32>} : memref<16x128xbf16, #tpu.memory_space<vmem>>, vector<16x128xbf16>,
    %c0_43 = arith.constant 0 : index
    %c0_44 = arith.constant 0 : index
    %100 = vector.load %arg8[%c0_43, %c0_44] : memref<16x128xbf16, #tpu.memory_space<vmem>>, vector<16x128xbf16>
    %c0_45 = arith.constant 0 : index
    %c0_46 = arith.constant 0 : index
    %101 = vector.load %arg4[%c0_45, %c0_46] : memref<128x128xbf16, #tpu.memory_space<vmem>>, vector<128x128xbf16>
    %cst_47 = arith.constant dense<0.000000e+00> : vector<16x128xf32>
    %102 = tpu.matmul %100, %101, %cst_47 {dimension_numbers = #tpu.dot_dimension_numbers<[1], [0], [0], [1], [0, 0, 1, 1], [], []>} : vector<16x128xbf16>, vector<128x128xbf16>, vector<16x128xf32> -> vector<16x128xf32>
    %c0_48 = arith.constant 0 : index
    %c0_49 = arith.constant 0 : index
    %103 = vector.load %arg5[%c0_48, %c0_49] : memref<1x128xf32, #tpu.memory_space<vmem>>, vector<1x128xf32>
    %104 = vector.broadcast %103 : vector<1x128xf32> to vector<16x128xf32>
    %105 = arith.addf %102, %104 : vector<16x128xf32>
    %106 = vector.shape_cast %105 : vector<16x128xf32> to vector<1x16x128xf32>
    %c0_50 = arith.constant 0 : index
    %c0_51 = arith.constant 0 : index
    %c0_52 = arith.constant 0 : index
    %107 = vector.load %arg6[%c0_50, %c0_51, %c0_52] : memref<1x16x128xf32, #tpu.memory_space<vmem>>, vector<1x16x128xf32>
    tpu.vector_store %arg6[%c0_50, %c0_51, %c0_52], %106 {strides = array<i32>} : memref<1x16x128xf32, #tpu.memory_space<vmem>>, vector<1x16x128xf32>,
    return
  }
  func.func @transform_0(%arg0: i32) -> (i32, i32, i32) {
    %c0_i32 = arith.constant 0 : i32
    %c0_i32_0 = arith.constant 0 : i32
    %c0_i32_1 = arith.constant 0 : i32
    return %arg0, %c0_i32, %c0_i32_0 : i32, i32, i32
  }
  func.func @transform_1(%arg0: i32) -> (i32, i32) {
    %c0_i32 = arith.constant 0 : i32
    %c0_i32_0 = arith.constant 0 : i32
    %c0_i32_1 = arith.constant 0 : i32
    return %c0_i32, %c0_i32_0 : i32, i32
  }
  func.func @transform_2(%arg0: i32) -> (i32, i32) {
    %c0_i32 = arith.constant 0 : i32
    %c0_i32_0 = arith.constant 0 : i32
    %c0_i32_1 = arith.constant 0 : i32
    return %c0_i32, %c0_i32_0 : i32, i32
  }
  func.func @transform_3(%arg0: i32) -> (i32, i32) {
    %c0_i32 = arith.constant 0 : i32
    %c0_i32_0 = arith.constant 0 : i32
    %c0_i32_1 = arith.constant 0 : i32
    return %c0_i32, %c0_i32_0 : i32, i32
  }
  func.func @transform_4(%arg0: i32) -> (i32, i32) {
    %c0_i32 = arith.constant 0 : i32
    %c0_i32_0 = arith.constant 0 : i32
    %c0_i32_1 = arith.constant 0 : i32
    return %c0_i32, %c0_i32_0 : i32, i32
  }
  func.func @transform_5(%arg0: i32) -> (i32, i32, i32) {
    %c0_i32 = arith.constant 0 : i32
    %c0_i32_0 = arith.constant 0 : i32
    %c0_i32_1 = arith.constant 0 : i32
    return %arg0, %c0_i32, %c0_i32_0 : i32, i32, i32
  }
}

</mosaic_0001>

<bundles_post_ra>
// kernel: tpu_custom_call.1
= control target key start
LH: loop header
LB: loop body
LE: loop exit
PB: predicated region body
PF: predicated region fallthrough
CT: control target
= control target key end

     0   :  { %10 = vsyncpa [#allocation5], 0  ;;  %s2176_s0 = inlined_call_operand.hbm [shape: bf16[2,16,128], index: 0, kind: input, shape index: {}]   ;;  %s2177_s1 = inlined_call_operand.hbm [shape: bf16[128,384], index: 1, kind: input, shape index: {}]   ;;  %s2178_s2 = inlined_call_operand.vmem [shape: f32[1,384], index: 2, kind: input, shape index: {}]   ;;  %s2179_s3 = inlined_call_operand.hbm [shape: bf16[128,128], index: 3, kind: input, shape index: {}]   ;;  %s2180_s4 = inlined_call_operand.vmem [shape: f32[1,128], index: 4, kind: input, shape index: {}]   ;;  %s2181_s5 = inlined_call_operand.hbm [shape: f32[2,16,128], index: 5, kind: output, shape index: {}]  }
   0x1   :  { %12 = vsyncpa [#allocation5 + $0x1], 0 }
   0x2   :  { %13 = vsyncpa [#allocation8], 0 }
   0x3   :  { %14 = vsyncpa [#allocation6], 0 }
   0x4   :  { %16 = vsyncpa [#allocation6 + $0x1], 0  ;;  %s1826_s18 = smov 0   ;;  %s1828_s19 = smov 0  }
   0x5   :  { %s1830_s20 = smov 0   ;;  %s1832_s21 = smov 0  }
   0x6 LB: > { %s1847_s22 = sadd.s32 4294967295, %s1778_s21   ;;  %s1286_s23 = sadd.s32 4294967294, %s1778_s21   ;;  %s1778_s21 = sphi %s1832_s21, %s2201_s21   ;;  %s1774_s20 = sphi %s1830_s20, %s2200_s20   ;;  %s1770_s19 = sphi %s1828_s19, %s2199_s19   ;;  %s1766_s18 = sphi %s1826_s18, %s2198_s18  }
   0x7   : > { %p42_p0 = scmp.ne.s32.totalorder %s1770_s19, %s1766_s18  ;;  %p2182_p1 = scmp.eq.s32.totalorder %s1847_s22, 0 }
   0x8   : > { %p156_p3 = scmp.eq.s32.totalorder %s1286_s23, 1  ;;  %p1287_p5 = scmp.ge.s32.totalorder %s1778_s21, 1 }
   0x9   : > { %p1856_p4 = por %p2182_p1, %p42_p0  ;;  %p163_p7 = scmp.lt.s32.totalorder %s1778_s21, 3 }
   0xa   : > { %p1861_p6 = por %p156_p3, %p42_p0  ;;  %s1780_s27 = smov [#allocation7]  }
   0xb   : > { %s2185_s24 = scalar_select %p1856_p4, 1, 0 }
   0xc   : > { %s2186_s25 = scalar_select %p1861_p6, 1, 0 }
   0xd   : > { %p1866_p8 = pnand %p1287_p5, %p163_p7  ;;  %s175_s28 = sshll.u32 %s1780_s27, 4  ;;  %s1870_s28 = int_to_ptr.vmem [resolvable:$true] %s175_s28 }
   0xe   : > { %s1781_s30 = smov [#allocation9]   ;;  %s1622_s9 = scalar_lea.hbm %s2177_s1, 3072 }
   0xf   : > { %p1482_p9 = pneg %p1866_p8  ;;  %s191_s6 = sshll.u32 %s1781_s30, 4  ;;  %s1881_s6 = int_to_ptr.vmem [resolvable:$true] %s191_s6 }
  0x10   : > { %p1623_p12 = scmp.ne.s32.totalorder %s2177_s1, %s1622_s9  ;;  %p1629_p5 = scmp.lt.u32.totalorder %s1622_s9, %s2177_s1 }
  0x11   : > { %p1877_p11 = pnand %p1482_p9, %p2182_p1 }
  0x13   : > { %p1624_p13 = pneg %p1877_p11 }
  0x15   : > { %p1625_p0 = pnand %p1624_p13, %p1623_p12 }
  0x17   : > { %p1626_p3 = pneg %p1625_p0 }
  0x19   : > { %p1631_p7 = pnand %p1629_p5, %p1626_p3 }
  0x1b   : > { %1634 = shalt.err (!%p1631_p7)
}
  0x1c   : > { %s1635_s14 = scalar_lea.vmem %s1870_s28, 3072  ;;  %p1643_p2 = scmp.lt.s32.totalorder %s1870_s28, %s1870_s28 }
  0x1d   : > { %p1636_p9 = scmp.ne.s32.totalorder %s1870_s28, %s1635_s14  ;;  %p1644_p12 = scmp.lt.s32.totalorder %s1635_s14, %s1635_s14 }
  0x1f   : > { %p1638_p10 = pnand %p1636_p9, %p1624_p13  ;;  %p1645_p0 = por %p1644_p12, %p1643_p2 }
  0x21   : > { %p1639_p1 = pneg %p1638_p10 }
  0x23   : > { %p1646_p6 = pnand %p1645_p0, %p1639_p1 }
  0x25   : > { %1649 = shalt.err (!%p1646_p6)
}
  0x26   : > { %s1782_s15 = smov 192   ;;  %s1783_s16 = smov 12  }
  0x27   : > { %1485 = dma.hbm_to_vmem [thread:$0]  (!%p1877_p11), %s2177_s1, 3072, %s1870_s28, [#allocation8], %s1782_s15, %s1782_s15, %s1783_s16  }
  0x28   : > { %s1650_s7 = scalar_lea.hbm %s2179_s3, 1024 }
  0x29   : > { %p1651_p2 = scmp.ne.s32.totalorder %s2179_s3, %s1650_s7  ;;  %p1657_p10 = scmp.lt.u32.totalorder %s1650_s7, %s2179_s3 }
  0x2b   : > { %p1653_p1 = pnand %p1651_p2, %p1624_p13 }
  0x2d   : > { %p1654_p6 = pneg %p1653_p1 }
  0x2f   : > { %p1659_p3 = pnand %p1657_p10, %p1654_p6 }
  0x31   : > { %1662 = shalt.err (!%p1659_p3)
}
  0x32   : > { %s1663_s28 = scalar_lea.vmem %s1881_s6, 1024  ;;  %p1671_p12 = scmp.lt.s32.totalorder %s1881_s6, %s1881_s6 }
  0x33   : > { %p1664_p5 = scmp.ne.s32.totalorder %s1881_s6, %s1663_s28  ;;  %p1672_p0 = scmp.lt.s32.totalorder %s1663_s28, %s1663_s28 }
  0x35   : > { %p1666_p7 = pnand %p1664_p5, %p1624_p13  ;;  %p1673_p2 = por %p1672_p0, %p1671_p12 }
  0x37   : > { %p1667_p9 = pneg %p1666_p7 }
  0x39   : > { %p1674_p1 = pnand %p1673_p2, %p1667_p9 }
  0x3b   : > { %1677 = shalt.err (!%p1674_p1)
}
  0x3c   : > { %s1784_s12 = smov 64   ;;  %s1785_s13 = smov 4  }
  0x3d   : > { %1488 = dma.hbm_to_vmem [thread:$0]  (!%p1877_p11), %s2179_s3, 1024, %s1881_s6, [#allocation8], %s1784_s12, %s1784_s12, %s1785_s13  }
  0x3e   : > { %s1939_s16 = sadd.s32 1, %s1778_s21   ;;  %s29_s23 = sadd.s32 1, %s1774_s20 }
  0x3f   : > { %s26_s17 = ssub.s32 %s1778_s21, %s1939_s16  ;;  %p36_p6 = scmp.ne.s32.totalorder %s1774_s20, %s1770_s19 }
  0x40   : > { %p27_p13 = scmp.eq.s32.totalorder %s26_s17, 0  ;;  %p37_p10 = scmp.eq.s32.totalorder %s1778_s21, 0 }
  0x41   : > { %p2189_p5 = scmp.eq.s32.totalorder %s1847_s22, 1  ;;  %p1499_p9 = scmp.lt.s32.totalorder %s1778_s21, 2 }
  0x42   : > { %s1948_s27 = scalar_select %p27_p13, %s1774_s20, %s29_s23  }
  0x43   : > { %p38_p3 = por %p37_p10, %p36_p6  ;;  %p1952_p7 = por %p2189_p5, %p36_p6 }
  0x44   : > { %s208_s30 = sand.u32 1, %s1774_s20   ;;  %s1346_s6 = sshll.u32 %s1778_s21, 7 }
  0x45   : > { %s2190_s29 = scalar_select %p1952_p7, 1, 0 }
  0x46   : > { %s1291_s7 = sshll.u32 %s208_s30, 3  ;;  %s1962_s10 = scalar_lea.hbm %s2176_s0, %s1346_s6 }
  0x47   : > { %s212_s11 = scalar_lea.vmem [#allocation4], %s1291_s7  ;;  %p1966_p11 = pnand %p1499_p9, %p38_p3 }
  0x48   : > { %s219_s28 = sshll.u32 %s212_s11, 4  ;;  %s1970_s15 = scalar_lea.sflag [#allocation5], %s208_s30  ;;  %s1964_s28 = int_to_ptr.vmem [resolvable:$true] %s219_s28 }
  0x49   : > { %s1678_s17 = scalar_lea.hbm %s1962_s10, 128  ;;  %p1680_p0 = pneg %p1966_p11 }
  0x4a   : > { %p1679_p12 = scmp.ne.s32.totalorder %s1962_s10, %s1678_s17  ;;  %s1683_s6 = scalar_lea.hbm %s2176_s0, 256 }
  0x4b   : > { %p1684_p13 = scmp.lt.u32.totalorder %s1962_s10, %s2176_s0  ;;  %p1685_p6 = scmp.lt.u32.totalorder %s1683_s6, %s1678_s17 }
  0x4c   : > { %p1681_p2 = pnand %p1680_p0, %p1679_p12  ;;  %p1687_p3 = scmp.lt.u32.totalorder %s1678_s17, %s1962_s10 }
  0x4d   : > { %p1686_p10 = por %p1685_p6, %p1684_p13 }
  0x4e   : > { %p1682_p1 = pneg %p1681_p2 }
  0x4f   : > { %p1688_p5 = por %p1687_p3, %p1686_p10 }
  0x51   : > { %p1689_p9 = pnand %p1688_p5, %p1682_p1 }
  0x53   : > { %1692 = shalt.err (!%p1689_p9)
}
  0x54   : > { %s1693_s30 = scalar_lea.vmem %s1964_s28, 128  ;;  %s1786_s11 = smov [#allocation4]  }
  0x55   : > { %p1694_p12 = scmp.ne.s32.totalorder %s1964_s28, %s1693_s30  ;;  %s1698_s23 = sshll.u32 %s1786_s11, 4  ;;  %s1699_s23 = int_to_ptr.vmem [resolvable:$false] %s1698_s23 }
  0x56   : > { %s1700_s7 = scalar_lea.vmem %s1699_s23, 256  ;;  %p1701_p4 = scmp.lt.s32.totalorder %s1964_s28, %s1699_s23 }
  0x57   : > { %p1696_p2 = pnand %p1694_p12, %p1680_p0  ;;  %p1702_p13 = scmp.lt.s32.totalorder %s1700_s7, %s1693_s30 }
  0x59   : > { %p1697_p7 = pneg %p1696_p2  ;;  %p1703_p6 = por %p1702_p13, %p1701_p4 }
  0x5b   : > { %p1704_p10 = pnand %p1703_p6, %p1697_p7 }
  0x5d   : > { %1707 = shalt.err (!%p1704_p10)
}
  0x5e   : > { %1492 = dma.hbm_to_vmem [thread:$0]  (!%p1966_p11), %s1962_s10, 128, %s1964_s28, %s1970_s15, %s1784_s12, %s1784_s12, %s1785_s13  }
  0x5f   : > { %231 = sbr.rel (%p1866_p8) target bundleno = 2035 (0x7f3), region = 40  ;;  %s2004_s17 = sand.u32 (!%p1866_p8), 1, %s1770_s19  }
  0x60   : > { %s1295_s6 = sshll.u32 (!%p1866_p8), %s2004_s17, 3  ;;  %s234_s8 = scalar_lea.sflag (!%p1866_p8), [#allocation5], %s2004_s17 }
  0x61   : > { %s2008_s9 = scalar_lea.vmem (!%p1866_p8), [#allocation4], %s1295_s6  ;;  %p2192_p4 = scmp.ne.s32.totalorder (!%p1866_p8), %s2185_s24, 0 }
  0x66   : > { %1753 = dma.done.wait (%p2192_p4), %s234_s8, 128  }
  0x67   : > { %1755 = vsyncadd (%p2192_p4), %s234_s8, 4294967168  ;;  %p2193_p7 = scmp.eq.s32.totalorder %s1847_s22, 0 }
  0x69   : > { %1757 = dma.done.wait (%p2193_p7), [#allocation8], 4096   ;;  %p2194_p8 = pmov %p2193_p7 }
  0x6a   : > { %v1787_v0 = vmov 0   ;;  %v1788_v1 = vmov 0.0   ;;  %v1549_v2 = vld [vmem:[#allocation7 + $0x4] ss:$12 sps:$4 sm:$0xff]   ;;  %v1551_v3 = vld [vmem:[#allocation7] ss:$12 sps:$4 sm:$0xff]   ;;  %v309_v27 = vlaneseq }
  0x6b   : > { %1759 = vsyncadd (%p2194_p8), [#allocation8], 4294963200  ;;  %490 = vmatprep.mubr.bf16.mxu0 %v1787_v0  ;;  %1382 = vmatprep.subr.bf16.mxu1 %v1788_v1  ;;  %v1552_v4 = vld [vmem:[#allocation7 + $0x1c] ss:$12 sps:$4 sm:$0xff]   ;;  %v1554_v5 = vld [vmem:[#allocation7 + $0x18] ss:$12 sps:$4 sm:$0xff]  }
  0x6c   : > { %458 = vmatprep.subr.bf16.mxu0 %v1549_v2  ;;  %v1555_v6 = vld [vmem:[#allocation7 + $0x34] ss:$12 sps:$4 sm:$0xff]   ;;  %v1557_v7 = vld [vmem:[#allocation7 + $0x30] ss:$12 sps:$4 sm:$0xff]   ;;  %v1558_v8 = vld [vmem:[#allocation7 + $0x4c] ss:$12 sps:$4 sm:$0xff]  }
  0x6d   : > { %459 = vmatpush1.bf16.msra.mxu0 %v1551_v3  ;;  %v1560_v9 = vld [vmem:[#allocation7 + $0x48] ss:$12 sps:$4 sm:$0xff]   ;;  %v1561_v10 = vld [vmem:[#allocation7 + $0x64] ss:$12 sps:$4 sm:$0xff]   ;;  %v1575_v12 = vld [vmem:[#allocation7 + $0x20] ss:$12 sps:$4 sm:$0xff]  }
  0x6e   : > { %460 = vmatprep.subr.bf16.mxu0 %v1552_v4  ;;  %v1574_v11 = vld [vmem:[#allocation7 + $0x8] ss:$12 sps:$4 sm:$0xff]   ;;  %v1563_v13 = vld [vmem:[#allocation7 + $0x60] ss:$12 sps:$4 sm:$0xff]   ;;  %v1566_v15 = vld [vmem:[#allocation7 + $0x78] ss:$12 sps:$4 sm:$0xff]  }
  0x6f   : > { %1383 = vmatpush3.bf16.msra.mxu1 %v1574_v11  ;;  %v1564_v14 = vld [vmem:[#allocation7 + $0x7c] ss:$12 sps:$4 sm:$0xff]   ;;  %v1567_v16 = vld [vmem:[#allocation7 + $0x94] ss:$12 sps:$4 sm:$0xff]   ;;  %v1576_v17 = vld [vmem:[#allocation7 + $0x38] ss:$12 sps:$4 sm:$0xff]  }
  0x70   : > { %1384 = vmatprep.subr.bf16.mxu1 %v1788_v1  ;;  %v1577_v18 = vld [vmem:[#allocation7 + $0x50] ss:$12 sps:$4 sm:$0xff]   ;;  %v1570_v20 = vld [vmem:[#allocation7 + $0xac] ss:$12 sps:$4 sm:$0xff]   ;;  %v1578_v21 = vld [vmem:[#allocation7 + $0x68] ss:$12 sps:$4 sm:$0xff]  }
  0x71   : > { %461 = vmatpush1.bf16.msra.mxu0 %v1554_v5  ;;  %v1569_v19 = vld [vmem:[#allocation7 + $0x90] ss:$12 sps:$4 sm:$0xff]   ;;  %v1572_v22 = vld [vmem:[#allocation7 + $0xa8] ss:$12 sps:$4 sm:$0xff]   ;;  %v1579_v24 = vld [vmem:[#allocation7 + $0x80] ss:$12 sps:$4 sm:$0xff]  }
  0x72   : > { %462 = vmatprep.subr.bf16.mxu0 %v1555_v6  ;;  %v1573_v23 = vld [vmem:[%s2008_s9] sm:$0xff]   ;;  %vm1789_vm0 = vmmov 0   ;;  %v310_v28 = vshrl.u32 %v309_v27, 7  ;;  %vm551_vm1 = vcmask 261120   ;;  %vm599_vm2 = vcmask 130048   ;;  %s1790_s12 = smov 96  }
  0x73   : > { %1385 = vmatpush3.bf16.msra.mxu1 %v1575_v12  ;;  %v1580_v25 = vld [vmem:[#allocation7 + $0x98] ss:$12 sps:$4 sm:$0xff]   ;;  %v1581_v26 = vld [vmem:[#allocation7 + $0xb0] ss:$12 sps:$4 sm:$0xff]   ;;  %1398 = vmatprep.mubr.msk.bf16.mxu1 %vm1789_vm0, %v1788_v1  ;;  %s1791_s13 = smov 32   ;;  %s1792_s10 = smov 64  }
  0x74   : > { %1386 = vmatprep.subr.bf16.mxu1 %v1788_v1  ;;  %v311_v29 = vsub.s32 0, %v310_v28  ;;  %v307_v30 = vld [vmem:[%s2178_s2] sm:$0x7]  ;;  %v315_v31 = vsub.s32 1, %v310_v28  ;;  %v319_v45 = vsub.s32 2, %v310_v28  ;;  %vm1057_vm3 = vcmask 523264  }
  0x75   : > { %463 = vmatpush1.bf16.msra.mxu0 %v1557_v7  ;;  %vm1060_vm4 = vcmask 785408   ;;  %s1298_s28 = sshll.u32 %s2004_s17, 4  ;;  %s1347_s23 = sshll.u32 %s1847_s22, 8 }
  0x76   : > { %464 = vmatprep.subr.bf16.mxu0 %v1558_v8  ;;  %v312_v32 = vrot.slane %v307_v30, %v311_v29  ;;  %v316_v34 = vrot.slane %v307_v30, %v315_v31  ;;  %v320_v46 = vrot.slane %v307_v30, %v319_v45  ;;  %s271_s30 = scalar_lea.vmem [#allocation10], %s1298_s28  ;;  %s2132_s8 = scalar_lea.hbm %s2181_s5, %s1347_s23 }
  0x77   : > { %1387 = vmatpush3.bf16.msra.mxu1 %v1576_v17  ;;  %s1194_s11 = sshll.u32 %s271_s30, 4  ;;  %s1181_s9 = scalar_lea.sflag [#allocation6], %s2004_s17  ;;  %s2127_s11 = int_to_ptr.vmem [resolvable:$true] %s1194_s11 }
  0x78   : > { %1388 = vmatprep.subr.bf16.mxu1 %v1788_v1  ;;  %s1708_s22 = scalar_lea.vmem %s2127_s11, 256  ;;  %p2195_p0 = scmp.ne.s32.totalorder %s2190_s29, 0 }
  0x79   : > { %465 = vmatpush1.bf16.msra.mxu0 %v1560_v9  ;;  %p1709_p11 = scmp.ne.s32.totalorder %s2127_s11, %s1708_s22  ;;  %s1793_s24 = smov [#allocation10]  }
  0x7a   : > { %466 = vmatprep.subr.bf16.mxu0 %v1561_v10  ;;  %s1712_s26 = sshll.u32 %s1793_s24, 4  ;;  %s1713_s26 = int_to_ptr.vmem [resolvable:$false] %s1712_s26 }
  0x7b   : > { %1389 = vmatpush3.bf16.msra.mxu1 %v1577_v18  ;;  %p1710_p1 = pnand %p1709_p11, %p2195_p0  ;;  %p1715_p5 = scmp.lt.s32.totalorder %s2127_s11, %s1713_s26 }
  0x7c   : > { %1390 = vmatprep.subr.bf16.mxu1 %v1788_v1 }
  0x7d   : > { %467 = vmatpush1.bf16.msra.mxu0 %v1563_v13  ;;  %p1711_p3 = pneg %p1710_p1 }
  0x7e   : > { %468 = vmatprep.subr.bf16.mxu0 %v1564_v14 }
  0x7f   : > { %1391 = vmatpush3.bf16.msra.mxu1 %v1578_v21 }
  0x80   : > { %1392 = vmatprep.subr.bf16.mxu1 %v1788_v1 }
  0x81   : > { %469 = vmatpush1.bf16.msra.mxu0 %v1566_v15 }
  0x82   : > { %470 = vmatprep.subr.bf16.mxu0 %v1567_v16 }
  0x83   : > { %1393 = vmatpush3.bf16.msra.mxu1 %v1579_v24 }
  0x84   : > { %1394 = vmatprep.subr.bf16.mxu1 %v1788_v1 }
  0x85   : > { %471 = vmatpush1.bf16.msra.mxu0 %v1569_v19 }
  0x86   : > { %472 = vmatprep.subr.bf16.mxu0 %v1570_v20 }
  0x87   : > { %1395 = vmatpush3.bf16.msra.mxu1 %v1580_v25 }
  0x88   : > { %1396 = vmatprep.subr.bf16.mxu1 %v1788_v1 }
  0x89   : > { %473 = vmatpush1.bf16.msra.mxu0 %v1572_v22 }
  0x8a   : > { %1426 = vmatprep.subr.bf16.mxu0 %v1788_v1 }
  0x8b   : > { %1397 = vmatpush3.bf16.msra.mxu1 %v1581_v26 }
  0x8c   : > { %491 = vmatmul.mubr.bf16.vlgmr.msra.gmra.mrb[0].mxu0 %v1573_v23  ;;  %1402 = vmatprep.subr.bf16.mxu1 %v1788_v1 }
  0x8d   : > { %1428 = vmatprep.mubr.msk.bf16.mxu0 %vm1789_vm0, %v1788_v1 }
  0x8e   : > { %1399 = vmatmul.mubr.bf16.vlgmr.msra.gmra.mrb[0].mxu1 %v1573_v23 }
  0x8f   : > { %1404 = vmatprep.mubr.msk.bf16.mxu1 %vm1789_vm0, %v1788_v1 }
 0x15f   : > { %v492_v33 = vpop.f32.mrb[0].mxu0 }
 0x160   : > { %v494_v35 = vpop.f32.mrb[1].mxu0  ;;  %v493_v37 = vadd.f32 %v492_v33, %v312_v32 }
 0x161   : > { %v496_v36 = vpop.f32.mrb[2].mxu0  ;;  %v495_v40 = vadd.f32 %v494_v35, %v316_v34  ;;  %v535_v47 = vpop.f32.mrb[0].mxu1 }
 0x162   : > { %v497_v38 = vadd.f32 %v496_v36, %v312_v32  ;;  %v498_v39 = vpop.f32.mrb[3].mxu0  ;;  %v536_v48 = vadd.f32 %v535_v47, %v320_v46  ;;  %v1400_v49 = vpop.f32.mrb[1].mxu1 }
 0x163   : > { %v499_v41 = vadd.f32 %v498_v39, %v316_v34  ;;  %v538_v50 = vpop.f32.mrb[2].mxu1 }
 0x164   : > { %v542_v42 = vpack.c.bf16 %v497_v38, %v493_v37  ;;  %v539_v51 = vadd.f32 %v538_v50, %v320_v46  ;;  %v1401_v52 = vpop.f32.mrb[3].mxu1 }
 0x165   : > { %v543_v43 = vpack.c.bf16 %v499_v41, %v495_v40 }
 0x166   : > { %v2043_v53 = vpack.c.bf16 %v539_v51, %v536_v48 }
 0x167   : > { %v556_v44 = vsel %vm551_vm1, %v543_v43, 0 }
 0x168   : > { %1403 = vmatpush3.bf16.xpose.msra.mxu1 %v556_v44 }
 0x169   : > { %1408 = vmatprep.subr.bf16.mxu1 %v1788_v1 }
 0x16f   : > { %1405 = vmatmul.mubr.msk.bf16.vlgmr.msra.gmra.mrb[4].mxu1 %vm551_vm1, %v542_v42 }
 0x170   : > { %1410 = vmatprep.mubr.msk.bf16.mxu1 %vm1789_vm0, %v1788_v1  ;;  %1409 = vmatpush3.bf16.msra.mxu1 %v2043_v53 }
 0x171   : > { %1414 = vmatprep.subr.bf16.mxu1 %v1788_v1 }
 0x242   : > { %v592_v54 = vpop.f32.mrb[4].mxu1 }
 0x243   : > { %v1406_v55 = vpop.f32.mrb[5].mxu1  ;;  %v600_v56 = vsel %vm599_vm2, %v592_v54, -inf }
 0x244   : > { %601 = vmax.xlane.f32.xlu0 %v600_v56  ;;  %v595_v57 = vpop.f32.mrb[6].mxu1 }
 0x245   : > { %v1407_v58 = vpop.f32.mrb[7].mxu1  ;;  %v603_v59 = vsel %vm599_vm2, %v595_v57, -inf }
 0x248   : > { %604 = vmax.xlane.f32.xlu0 %v603_v59 }
 0x25e   : > { %674 = vrot.lane.b32.xlu0 %v543_v43, %s1790_s12 }
 0x262   : > { %923 = vrot.lane.b32.xlu0 %v543_v43, %s1791_s13 }
 0x2d1   : > { %v602_v60 = vpop.xlane.xlu0 %601 }
 0x2d2   : > { %v606_v61 = vsub.f32 %v592_v54, %v602_v60 }
 0x2d4   : > { %v608_v62 = vmul.f32 1.442695, %v606_v61 }
 0x2d5   : > { %v605_v63 = vpop.xlane.xlu0 %604 }
 0x2d6   : > { %1590 = vpow2.f32 %v608_v62  ;;  %v607_v0 = vsub.f32 %v595_v57, %v605_v63 }
 0x2d8   : > { %v610_v2 = vmul.f32 1.442695, %v607_v0 }
 0x2d9   : > { %v675_v11 = vpop.permute.xlu0 %674 }
 0x2da   : > { %1592 = vpow2.f32 %v610_v2  ;;  %v680_v23 = vsel %vm551_vm1, %v675_v11, 0 }
 0x2dd   : > { %v924_v17 = vpop.permute.xlu0 %923 }
 0x2de   : > { %v929_v22 = vsel %vm551_vm1, %v924_v17, 0 }
 0x2e0   : > { %v1591_v3 = vpop.eup %1590 }
 0x2e1   : > { %v612_v4 = vsel %vm599_vm2, %v1591_v3, 0.0 }
 0x2e2   : > { %613 = vadd.xlane.f32.xlu1 %v612_v4 }
 0x2e4   : > { %v1593_v5 = vpop.eup %1592 }
 0x2e5   : > { %v615_v6 = vsel %vm599_vm2, %v1593_v5, 0.0 }
 0x2e6   : > { %616 = vadd.xlane.f32.xlu1 %v615_v6 }
 0x2f7   : > { %671 = vrot.lane.b32.xlu1 %v542_v42, %s1790_s12 }
 0x2fb   : > { %799 = vrot.lane.b32.xlu1 %v543_v43, %s1792_s10 }
 0x2ff   : > { %797 = vrot.lane.b32.xlu1 %v542_v42, %s1792_s10 }
 0x303   : > { %921 = vrot.lane.b32.xlu1 %v542_v42, %s1791_s13 }
 0x36f   : > { %v614_v7 = vpop.xlane.xlu1 %613 }
 0x370   : > { %1594 = vrcp.f32 %v614_v7 }
 0x373   : > { %v617_v8 = vpop.xlane.xlu1 %616 }
 0x374   : > { %1596 = vrcp.f32 %v617_v8 }
 0x377   : > { %v672_v9 = vpop.permute.xlu1 %671 }
 0x37a   : > { %v1595_v10 = vpop.eup %1594 }
 0x37b   : > { %v800_v12 = vpop.permute.xlu1 %799  ;;  %v620_v14 = vmul.f32 0.17677669, %v1595_v10 }
 0x37c   : > { %v805_v13 = vsel %vm551_vm1, %v800_v12, 0 }
 0x37d   : > { %1427 = vmatpush3.bf16.xpose.msra.mxu0 %v805_v13  ;;  %v622_v18 = vmul.f32 %v1591_v3, %v620_v14 }
 0x37e   : > { %v1597_v15 = vpop.eup %1596  ;;  %1438 = vmatprep.subr.bf16.mxu0 %v1788_v1 }
 0x37f   : > { %v621_v16 = vmul.f32 0.17677669, %v1597_v15  ;;  %v798_v21 = vpop.permute.xlu1 %797 }
 0x381   : > { %v623_v19 = vmul.f32 %v1593_v5, %v621_v16 }
 0x383   : > { %v624_v20 = vpack.c.bf16 %v623_v19, %v622_v18  ;;  %v922_v24 = vpop.permute.xlu1 %921 }
 0x384   : > { %1429 = vmatmul.mubr.msk.bf16.vlgmr.msra.gmra.mrb[4].mxu0 %vm551_vm1, %v798_v21 }
 0x385   : > { %1411 = vmatmul.mubr.msk.bf16.vlgmr.msra.gmra.mrb[8].mxu1 %vm599_vm2, %v624_v20  ;;  %1439 = vmatpush3.bf16.xpose.msra.mxu0 %v929_v22 }
 0x386   : > { %1415 = vmatpush3.bf16.xpose.msra.mxu1 %v680_v23  ;;  %1440 = vmatprep.mubr.msk.bf16.mxu0 %vm1789_vm0, %v1788_v1 }
 0x387   : > { %1416 = vmatprep.mubr.msk.bf16.mxu1 %vm1789_vm0, %v1788_v1  ;;  %1420 = vmatprep.subr.bf16.mxu1 %v1788_v1 }
 0x388   : > { %1450 = vmatprep.subr.bf16.mxu0 %v1788_v1 }
 0x38c   : > { %1441 = vmatmul.mubr.msk.bf16.vlgmr.msra.gmra.mrb[8].mxu0 %vm551_vm1, %v922_v24 }
 0x38d   : > { %1417 = vmatmul.mubr.msk.bf16.vlgmr.msra.gmra.mrb[12].mxu1 %vm551_vm1, %v672_v9  ;;  %1466 = vmatprep.mubr.msk.bf16.mxu0 %vm1789_vm0, %v1788_v1 }
 0x38e   : > { %1422 = vmatprep.mubr.msk.bf16.mxu1 %vm1789_vm0, %v1788_v1 }
 0x457   : > { %v841_v25 = vpop.f32.mrb[4].mxu0 }
 0x458   : > { %v2075_v26 = vpop.f32.mrb[8].mxu1  ;;  %v1430_v27 = vpop.f32.mrb[5].mxu0  ;;  %v848_v44 = vsel %vm599_vm2, %v841_v25, -inf }
 0x459   : > { %v1412_v28 = vpop.f32.mrb[9].mxu1  ;;  %v844_v29 = vpop.f32.mrb[6].mxu0 }
 0x45a   : > { %v2077_v30 = vpop.f32.mrb[10].mxu1  ;;  %v1431_v31 = vpop.f32.mrb[7].mxu0  ;;  %v851_v46 = vsel %vm599_vm2, %v844_v29, -inf }
 0x45b   : > { %v669_v32 = vpack.c.bf16 %v2077_v30, %v2075_v26  ;;  %v1413_v33 = vpop.f32.mrb[11].mxu1 }
 0x45f   : > { %v965_v34 = vpop.f32.mrb[8].mxu0 }
 0x460   : > { %v716_v35 = vpop.f32.mrb[12].mxu1  ;;  %v1442_v36 = vpop.f32.mrb[9].mxu0  ;;  %v972_v47 = vsel %vm599_vm2, %v965_v34, -inf }
 0x461   : > { %v1418_v37 = vpop.f32.mrb[13].mxu1  ;;  %v968_v38 = vpop.f32.mrb[10].mxu0  ;;  %v723_v39 = vsel %vm599_vm2, %v716_v35, -inf }
 0x462   : > { %v1443_v40 = vpop.f32.mrb[11].mxu0  ;;  %724 = vmax.xlane.f32.xlu0 %v723_v39  ;;  %v719_v41 = vpop.f32.mrb[14].mxu1  ;;  %v975_v45 = vsel %vm599_vm2, %v968_v38, -inf }
 0x463   : > { %v1419_v42 = vpop.f32.mrb[15].mxu1  ;;  %v726_v43 = vsel %vm599_vm2, %v719_v41, -inf }
 0x464   : > { %727 = vmax.xlane.f32.xlu1 %v726_v43 }
 0x466   : > { %849 = vmax.xlane.f32.xlu0 %v848_v44 }
 0x468   : > { %976 = vmax.xlane.f32.xlu1 %v975_v45 }
 0x46a   : > { %852 = vmax.xlane.f32.xlu0 %v851_v46 }
 0x46e   : > { %973 = vmax.xlane.f32.xlu0 %v972_v47 }
 0x4ef   : > { %v725_v48 = vpop.xlane.xlu0 %724 }
 0x4f0   : > { %v729_v58 = vsub.f32 %v716_v35, %v725_v48  ;;  %v1582_v48 = vld [vmem:[#allocation9] sm:$0xff]  }
 0x4f1   : > { %v728_v49 = vpop.xlane.xlu1 %727  ;;  %1451 = vmatpush3.bf16.msra.mxu0 %v1582_v48 }
 0x4f2   : > { %v730_v59 = vsub.f32 %v719_v41, %v728_v49  ;;  %v731_v0 = vmul.f32 1.442695, %v729_v58  ;;  %v1583_v49 = vld [vmem:[#allocation9 + $0x8] sm:$0xff]   ;;  %1452 = vmatprep.subr.bf16.mxu0 %v1788_v1 }
 0x4f3   : > { %v850_v50 = vpop.xlane.xlu0 %849 }
 0x4f4   : > { %v854_v51 = vsub.f32 %v841_v25, %v850_v50  ;;  %v733_v2 = vmul.f32 1.442695, %v730_v59  ;;  %v1584_v50 = vld [vmem:[#allocation9 + $0x10] sm:$0xff]   ;;  %v1589_v59 = vld [vmem:[#allocation9 + $0x38] sm:$0xff]  }
 0x4f5   : > { %v977_v52 = vpop.xlane.xlu1 %976  ;;  %1453 = vmatpush3.bf16.msra.mxu0 %v1583_v49 }
 0x4f6   : > { %v856_v54 = vmul.f32 1.442695, %v854_v51  ;;  %v979_v55 = vsub.f32 %v968_v38, %v977_v52  ;;  %1454 = vmatprep.subr.bf16.mxu0 %v1788_v1  ;;  %v1585_v51 = vld [vmem:[#allocation9 + $0x18] sm:$0xff]   ;;  %v1586_v52 = vld [vmem:[#allocation9 + $0x20] sm:$0xff]  }
 0x4f7   : > { %v853_v56 = vpop.xlane.xlu0 %852 }
 0x4f8   : > { %1598 = vpow2.f32 %v856_v54  ;;  %v855_v57 = vsub.f32 %v844_v29, %v853_v56  ;;  %v982_v60 = vmul.f32 1.442695, %v979_v55  ;;  %v1587_v54 = vld [vmem:[#allocation9 + $0x28] sm:$0xff]   ;;  %v1588_v56 = vld [vmem:[#allocation9 + $0x30] sm:$0xff]  }
 0x4f9   : > { %1455 = vmatpush3.bf16.msra.mxu0 %v1584_v50 }
 0x4fa   : > { %v858_v61 = vmul.f32 1.442695, %v855_v57  ;;  %1456 = vmatprep.subr.bf16.mxu0 %v1788_v1 }
 0x4fb   : > { %v974_v62 = vpop.xlane.xlu0 %973 }
 0x4fc   : > { %1600 = vpow2.f32 %v858_v61  ;;  %v978_v63 = vsub.f32 %v965_v34, %v974_v62 }
 0x4fd   : > { %1602 = vpow2.f32 %v982_v60  ;;  %1457 = vmatpush3.bf16.msra.mxu0 %v1585_v51 }
 0x4fe   : > { %v980_v3 = vmul.f32 1.442695, %v978_v63  ;;  %1458 = vmatprep.subr.bf16.mxu0 %v1788_v1 }
 0x500   : > { %1604 = vpow2.f32 %v980_v3 }
 0x501   : > { %1606 = vpow2.f32 %v731_v0  ;;  %1459 = vmatpush3.bf16.msra.mxu0 %v1586_v52 }
 0x502   : > { %v1599_v4 = vpop.eup %1598  ;;  %1608 = vpow2.f32 %v733_v2  ;;  %1460 = vmatprep.subr.bf16.mxu0 %v1788_v1 }
 0x503   : > { %v860_v5 = vsel %vm599_vm2, %v1599_v4, 0.0 }
 0x504   : > { %861 = vadd.xlane.f32.xlu0 %v860_v5 }
 0x505   : > { %1461 = vmatpush3.bf16.msra.mxu0 %v1587_v54 }
 0x506   : > { %v1601_v6 = vpop.eup %1600  ;;  %1462 = vmatprep.subr.bf16.mxu0 %v1788_v1 }
 0x507   : > { %v863_v7 = vsel %vm599_vm2, %v1601_v6, 0.0  ;;  %v1603_v8 = vpop.eup %1602 }
 0x508   : > { %864 = vadd.xlane.f32.xlu1 %v863_v7  ;;  %v987_v12 = vsel %vm599_vm2, %v1603_v8, 0.0 }
 0x509   : > { %1463 = vmatpush3.bf16.msra.mxu0 %v1588_v56 }
 0x50a   : > { %v1605_v9 = vpop.eup %1604  ;;  %1464 = vmatprep.subr.bf16.mxu0 %v1788_v1 }
 0x50b   : > { %v1607_v10 = vpop.eup %1606  ;;  %v984_v11 = vsel %vm599_vm2, %v1605_v9, 0.0 }
 0x50c   : > { %v1609_v13 = vpop.eup %1608  ;;  %985 = vadd.xlane.f32.xlu0 %v984_v11  ;;  %988 = vadd.xlane.f32.xlu1 %v987_v12  ;;  %v735_v14 = vsel %vm599_vm2, %v1607_v10, 0.0 }
 0x50d   : > { %v738_v15 = vsel %vm599_vm2, %v1609_v13, 0.0  ;;  %1465 = vmatpush3.bf16.msra.mxu0 %v1589_v59 }
 0x510   : > { %736 = vadd.xlane.f32.xlu0 %v735_v14  ;;  %739 = vadd.xlane.f32.xlu1 %v738_v15  ;;  %v1332_v14 = vld [vmem:[%s2180_s4] ss:$0 sm:$0xff] }
 0x521   : > { %873 = vrot.lane.b32.xlu1 %v2043_v53, %s1792_s10 }
 0x525   : > { %997 = vrot.lane.b32.xlu1 %v2043_v53, %s1791_s13 }
 0x526   : > { %749 = vrot.lane.b32.xlu0 %v2043_v53, %s1790_s12 }
 0x591   : > { %v862_v16 = vpop.xlane.xlu0 %861 }
 0x595   : > { %v865_v17 = vpop.xlane.xlu1 %864 }
 0x599   : > { %v986_v18 = vpop.xlane.xlu0 %985  ;;  %v989_v19 = vpop.xlane.xlu1 %988 }
 0x59d   : > { %v737_v20 = vpop.xlane.xlu0 %736  ;;  %v740_v21 = vpop.xlane.xlu1 %739 }
 0x59e   : > { %1610 = vrcp.f32 %v737_v20 }
 0x59f   : > { %1612 = vrcp.f32 %v740_v21 }
 0x5a0   : > { %1614 = vrcp.f32 %v865_v17 }
 0x5a1   : > { %v750_v22 = vpop.permute.xlu0 %749  ;;  %1616 = vrcp.f32 %v862_v16  ;;  %v874_v36 = vpop.permute.xlu1 %873 }
 0x5a2   : > { %1421 = vmatpush3.bf16.msra.mxu1 %v750_v22  ;;  %1618 = vrcp.f32 %v986_v18 }
 0x5a3   : > { %1432 = vmatprep.subr.bf16.mxu1 %v1788_v1  ;;  %1620 = vrcp.f32 %v989_v19 }
 0x5a5   : > { %v998_v44 = vpop.permute.xlu1 %997 }
 0x5a8   : > { %v1611_v23 = vpop.eup %1610 }
 0x5a9   : > { %v1613_v24 = vpop.eup %1612  ;;  %v743_v25 = vmul.f32 0.17677669, %v1611_v23 }
 0x5aa   : > { %v744_v53 = vmul.f32 0.17677669, %v1613_v24  ;;  %v1615_v27 = vpop.eup %1614 }
 0x5ab   : > { %v745_v28 = vmul.f32 %v1607_v10, %v743_v25  ;;  %v1617_v31 = vpop.eup %1616  ;;  %v869_v33 = vmul.f32 0.17677669, %v1615_v27 }
 0x5ac   : > { %v746_v29 = vmul.f32 %v1609_v13, %v744_v53  ;;  %v868_v35 = vmul.f32 0.17677669, %v1617_v31  ;;  %v1619_v37 = vpop.eup %1618 }
 0x5ad   : > { %v871_v38 = vmul.f32 %v1601_v6, %v869_v33  ;;  %v1621_v39 = vpop.eup %1620  ;;  %v992_v42 = vmul.f32 0.17677669, %v1619_v37 }
 0x5ae   : > { %v747_v34 = vpack.c.bf16 %v746_v29, %v745_v28  ;;  %v870_v40 = vmul.f32 %v1599_v4, %v868_v35  ;;  %v993_v43 = vmul.f32 0.17677669, %v1621_v39 }
 0x5af   : > { %v994_v45 = vmul.f32 %v1605_v9, %v992_v42 }
 0x5b0   : > { %1423 = vmatmul.mubr.msk.bf16.vlgmr.msra.gmra.mrb[16].mxu1 %vm599_vm2, %v747_v34  ;;  %v872_v41 = vpack.c.bf16 %v871_v38, %v870_v40  ;;  %v995_v46 = vmul.f32 %v1603_v8, %v993_v43 }
 0x5b1   : > { %1433 = vmatpush3.bf16.msra.mxu1 %v874_v36  ;;  %1434 = vmatprep.mubr.msk.bf16.mxu1 %vm1789_vm0, %v1788_v1 }
 0x5b2   : > { %1444 = vmatprep.subr.bf16.mxu1 %v1788_v1  ;;  %v996_v47 = vpack.c.bf16 %v995_v46, %v994_v45 }
 0x5b8   : > { %1435 = vmatmul.mubr.msk.bf16.vlgmr.msra.gmra.mrb[20].mxu1 %vm599_vm2, %v872_v41 }
 0x5b9   : > { %1445 = vmatpush3.bf16.msra.mxu1 %v998_v44  ;;  %1446 = vmatprep.mubr.msk.bf16.mxu1 %vm1789_vm0, %v1788_v1 }
 0x5c0   : > { %1447 = vmatmul.mubr.msk.bf16.vlgmr.msra.gmra.mrb[24].mxu1 %vm599_vm2, %v996_v47 }
 0x683   : > { %v789_v55 = vpop.f32.mrb[16].mxu1 }
 0x684   : > { %v1424_v57 = vpop.f32.mrb[17].mxu1 }
 0x685   : > { %v792_v58 = vpop.f32.mrb[18].mxu1 }
 0x686   : > { %v796_v60 = vpack.c.bf16 %v792_v58, %v789_v55  ;;  %v1425_v61 = vpop.f32.mrb[19].mxu1 }
 0x688   : > { %1046 = vrot.lane.b32.xlu1 %v796_v60, %s1791_s13 }
 0x68b   : > { %v913_v62 = vpop.f32.mrb[20].mxu1 }
 0x68c   : > { %v1436_v63 = vpop.f32.mrb[21].mxu1 }
 0x68d   : > { %v916_v0 = vpop.f32.mrb[22].mxu1 }
 0x68e   : > { %v920_v2 = vpack.c.bf16 %v916_v0, %v913_v62  ;;  %v1437_v3 = vpop.f32.mrb[23].mxu1 }
 0x690   : > { %1049 = vrot.lane.b32.xlu0 %v920_v2, %s1792_s10 }
 0x693   : > { %v1037_v4 = vpop.f32.mrb[24].mxu1 }
 0x694   : > { %v1448_v5 = vpop.f32.mrb[25].mxu1 }
 0x695   : > { %v1040_v6 = vpop.f32.mrb[26].mxu1 }
 0x696   : > { %v1044_v7 = vpack.c.bf16 %v1040_v6, %v1037_v4  ;;  %v1449_v8 = vpop.f32.mrb[27].mxu1 }
 0x698   : > { %1052 = vrot.lane.b32.xlu1 %v1044_v7, %s1790_s12  ;;  %s1714_s12 = scalar_lea.vmem %s1713_s26, 512 }
 0x699   : > { %p1716_p9 = scmp.lt.s32.totalorder %s1714_s12, %s1708_s22 }
 0x69b   : > { %p1717_p12 = por %p1716_p9, %p1715_p5 }
 0x69d   : > { %p1718_p2 = pnand %p1717_p12, %p1711_p3 }
 0x6fa   : > { %v1047_v1 = vpop.permute.xlu1 %1046 }
 0x6fb   : > { %v1056_v10 = vsel %vm551_vm1, %v669_v32, %v1047_v1 }
 0x702   : > { %v1050_v9 = vpop.permute.xlu0 %1049 }
 0x703   : > { %v1059_v11 = vsel %vm1057_vm3, %v1056_v10, %v1050_v9 }
 0x70a   : > { %v1053_v12 = vpop.permute.xlu1 %1052 }
 0x70b   : > { %v1062_v13 = vsel %vm1060_vm4, %v1059_v11, %v1053_v12 }
 0x70c   : > { %1467 = vmatmul.mubr.bf16.vlgmr.msra.gmra.mrb[12].mxu0 %v1062_v13 }
 0x7df   : > { %v1171_v15 = vpop.f32.mrb[12].mxu0 }
 0x7e0   : > { %v1172_v16 = vadd.f32 %v1332_v14, %v1171_v15  ;;  %v1468_v26 = vpop.f32.mrb[13].mxu0 }
 0x7e1   : > { %v1174_v30 = vpop.f32.mrb[14].mxu0 }
 0x7e2   : > { %1178 = vst [vmem:[%s271_s30] sm:$0xff] %v1172_v16  ;;  %v1175_v32 = vadd.f32 %v1332_v14, %v1174_v30  ;;  %v1469_v17 = vpop.f32.mrb[15].mxu0 }
 0x7e4   : > { %1179 = vst [vmem:[%s271_s30 + $0x8] sm:$0xff] %v1175_v32 }
 0x7e5   : > { %1721 = shalt.err (!%p1718_p2)
}
 0x7e6   : > { %s1722_s13 = scalar_lea.hbm %s2132_s8, 256  ;;  %s1726_s14 = scalar_lea.hbm %s2181_s5, 512 }
 0x7e7   : > { %p1723_p13 = scmp.ne.s32.totalorder %s2132_s8, %s1722_s13  ;;  %p1727_p4 = scmp.lt.u32.totalorder %s2132_s8, %s2181_s5 }
 0x7e8   : > { %p1728_p7 = scmp.lt.u32.totalorder %s1726_s14, %s1722_s13  ;;  %p1730_p11 = scmp.lt.u32.totalorder %s1722_s13, %s2132_s8 }
 0x7e9   : > { %p1724_p6 = pnand %p1723_p13, %p2195_p0 }
 0x7ea   : > { %p1729_p8 = por %p1728_p7, %p1727_p4 }
 0x7eb   : > { %p1725_p10 = pneg %p1724_p6 }
 0x7ec   : > { %p1731_p1 = por %p1730_p11, %p1729_p8 }
 0x7ee   : > { %p1732_p3 = pnand %p1731_p1, %p1725_p10 }
 0x7f0   : > { %1735 = shalt.err (!%p1732_p3)
}
 0x7f1   : > { %s1794_s23 = smov 128   ;;  %s1795_s7 = smov 8  }
 0x7f2   : > { %1480 = dma.vmem_to_hbm [thread:$0]  (%p2195_p0), %s2127_s11, 256, %s2132_s8, %s1181_s9, %s1794_s23, %s1794_s23, %s1795_s7  }
 0x7f3 PF: > { %s1209_s6 = sand.u32 1, %s1766_s18   ;;  %p2196_p5 = scmp.ne.s32.totalorder %s2186_s25, 0 }
 0x7f4   : > { %p2197_p9 = scmp.ge.s32.totalorder %s1778_s21, 2  ;;  %s1210_s22 = scalar_lea.sflag [#allocation6], %s1209_s6 }
 0x7f6   : > { %p1494_p12 = pnand %p2197_p9, %p2196_p5 }
 0x7f8   : > { %1761 = dma.done.wait (!%p1494_p12), %s1210_s22, 256  }
 0x7f9   : > { %1763 = vsyncadd (!%p1494_p12), %s1210_s22, 4294967040  ;;  %p19_p2 = scmp.ge.s32.totalorder %s1939_s16, 4   ;;  %s2198_s18 = smov %s1770_s19 }
 0x7fa   : > { %s2199_s19 = smov %s1774_s20  ;;  %s2200_s20 = smov %s1948_s27 }
 0x7fb   : > { %s2201_s21 = smov %s1939_s16  ;;  %21 = sbr.rel (!%p19_p2) target bundleno = 6 (0x6), region = 93 }
 0x802   :  { %1215 = vsyncpa [#allocation5], 1 }
 0x803   :  { %1217 = vsyncpa [#allocation5 + $0x1], 1 }
 0x804   :  { %1218 = vsyncpa [#allocation8], 1 }
 0x805   :  { %1219 = vsyncpa [#allocation6], 1 }
 0x806   :  { %1221 = vsyncpa [#allocation6 + $0x1], 1 }

</bundles_post_ra>
